<compile_context>
chip_gen: v7x
topology: tpu7x:2x2x1
jax: 0.10.0
libtpu: 0.0.40
codegen_flags: <defaults>
</compile_context>

<pallas_src>
import jax
import jax.numpy as jnp
from jax.experimental import pallas as pl
from jax.experimental.pallas import tpu as pltpu
import numpy as np

_LANES = 128        # lane width of a vreg
_U8_SUBLANES = 32   # uint8 packs 32 sublane rows per vreg (f32 packs 8; 32 covers both)
_MAX_ROW_TILE = 1024  # 1024*128*3*(1+4) B ~= 1.9 MiB/step; x2 buffers < 4 MiB


def _make_kernel(C, scale, bias):
    """Kernel with scale/bias baked as compile-time scalar constants."""
    scale = tuple(float(s) for s in scale)
    bias = tuple(float(b) for b in bias)

    def kernel(x_ref, o_ref):
        # x_ref: (1, C, r_tile, 128) uint8 (or float) tile, sublane/lane dense
        # o_ref: (1, C, r_tile, 128) float32 tile
        for c in range(C):  # static tiny channel loop; each slab is vreg-dense
            xc = x_ref[0, c, :, :].astype(jnp.float32)
            o_ref[0, c, :, :] = xc * scale[c] - bias[c]

    return kernel


def _pick_row_tile(R):
    """Row-block size: multiple of 32 (dense u8/f32 sublanes), capped for VMEM,
    and small enough that typical images produce >=2 grid steps (v7x megacore)."""
    if R <= _U8_SUBLANES:
        return R                      # single block; block dims == full array dims
    tile = min(_MAX_ROW_TILE, (R + 1) // 2)
    tile = max(_U8_SUBLANES, (tile // _U8_SUBLANES) * _U8_SUBLANES)
    return tile


def numpy_normalize(img, mean, std):
    """img: (H, W, C) or (B, H, W, C), typically uint8.
    Returns (C, H, W) or (B, C, H, W) float32."""
    squeeze = (img.ndim == 3)
    if squeeze:
        img = img[None]
    B, H, W, C = img.shape
    assert len(mean) == C and len(std) == C

    # Folded affine in f32:  (x/255 - mean)/std == x*scale - bias   (compile-time)
    scale = [1.0 / (255.0 * float(s)) for s in std]
    bias = [float(m) / float(s) for m, s in zip(mean, std)]

    # Layout glue (stays in the input dtype, no f32 materialization):
    # HWC -> CHW, flatten spatial, pad to a multiple of 128 lanes, and view as
    # (B, C, R, 128) so every kernel block is sublane- and lane-dense.
    hw = H * W
    x = jnp.transpose(img, (0, 3, 1, 2)).reshape(B, C, hw)
    hw_pad = ((hw + _LANES - 1) // _LANES) * _LANES
    if hw_pad != hw:
        x = jnp.pad(x, ((0, 0), (0, 0), (0, hw_pad - hw)))
    R = hw_pad // _LANES
    x = x.reshape(B, C, R, _LANES)

    r_tile = _pick_row_tile(R)
    grid = (B, pl.cdiv(R, r_tile))
    block = (1, C, r_tile, _LANES)

    out = pl.pallas_call(
        _make_kernel(C, scale, bias),
        out_shape=jax.ShapeDtypeStruct((B, C, R, _LANES), jnp.float32),
        grid=grid,
        in_specs=[pl.BlockSpec(block, lambda b, i: (b, 0, i, 0))],
        out_specs=pl.BlockSpec(block, lambda b, i: (b, 0, i, 0)),
        compiler_params=pltpu.CompilerParams(
            dimension_semantics=("parallel", "parallel"),
            vmem_limit_bytes=16 * 1024 * 1024,  # real need < 4 MiB double-buffered
        ),
    )(x)

    out = out.reshape(B, C, hw_pad)[:, :, :hw].reshape(B, C, H, W)
    if squeeze:
        out = out[0]
    return out


if __name__ == "__main__":
    # CLIP-style per-channel mean/std, as used by the kosmos-g pipeline.
    mean = [0.48145466, 0.4578275, 0.40821073]
    std = [0.26862954, 0.26130258, 0.27577711]

    H, W, C = 16, 16, 3
    key = jax.random.PRNGKey(0)

    # --- Single image (exactly the module's forward on one PIL-style image) ---
    img = jax.random.randint(key, (H, W, C), 0, 256, dtype=jnp.int32).astype(jnp.uint8)
    out = jax.block_until_ready(numpy_normalize(img, mean, std))

    img_np = np.asarray(img)
    ref = img_np.transpose(2, 0, 1).astype(np.float32) / 255.0
    ref -= np.array(mean, np.float32).reshape(-1, 1, 1)
    ref /= np.array(std, np.float32).reshape(-1, 1, 1)
    np.testing.assert_allclose(np.asarray(out), ref, rtol=1e-5, atol=1e-5)

    # --- Batched path (amortizes launch overhead; feeds both v7x TensorCores) ---
    B = 2
    imgs = jax.random.randint(jax.random.PRNGKey(0), (B, H, W, C), 0, 256,
                              dtype=jnp.int32).astype(jnp.uint8)
    outs = jax.block_until_ready(numpy_normalize(imgs, mean, std))

    refs = np.asarray(imgs).transpose(0, 3, 1, 2).astype(np.float32) / 255.0
    refs -= np.array(mean, np.float32).reshape(1, -1, 1, 1)
    refs /= np.array(std, np.float32).reshape(1, -1, 1, 1)
    np.testing.assert_allclose(np.asarray(outs), refs, rtol=1e-5, atol=1e-5)

    print("KERNEL_OK")
</pallas_src>

<mosaic_0001>
module attributes {stable_mosaic.version = 11 : i64} {
  func.func @kernel(%arg0: i32, %arg1: i32, %arg2: memref<1x3x2x128xi8, #tpu.memory_space<vmem>>, %arg3: memref<1x3x2x128xf32, #tpu.memory_space<vmem>>) attributes {dimension_semantics = [#tpu.dimension_semantics<parallel>, #tpu.dimension_semantics<parallel>], iteration_bounds = array<i64: 1, 1>, scalar_prefetch = 0 : i64, scratch_operands = 0 : i64, tpu.core_type = #tpu.core_type<tc>, window_params = [{transform_indices = @transform_0, window_bounds = array<i64: 1, 3, 2, 128>}, {transform_indices = @transform_1, window_bounds = array<i64: 1, 3, 2, 128>}]} {
    %c0 = arith.constant 0 : index
    %c0_0 = arith.constant 0 : index
    %c0_1 = arith.constant 0 : index
    %c0_2 = arith.constant 0 : index
    %0 = vector.load %arg2[%c0, %c0_0, %c0_1, %c0_2] : memref<1x3x2x128xi8, #tpu.memory_space<vmem>>, vector<1x1x2x128xi8>
    %1 = vector.shape_cast %0 : vector<1x1x2x128xi8> to vector<2x128xi8>
    %2 = arith.uitofp %1 : vector<2x128xi8> to vector<2x128xf32>
    %cst = arith.constant 0.0145984264 : f32
    %3 = vector.broadcast %cst : f32 to vector<2x128xf32>
    %4 = arith.mulf %2, %3 : vector<2x128xf32>
    %cst_3 = arith.constant 1.79226255 : f32
    %5 = vector.broadcast %cst_3 : f32 to vector<2x128xf32>
    %6 = arith.subf %4, %5 : vector<2x128xf32>
    %c0_4 = arith.constant 0 : index
    %c0_5 = arith.constant 0 : index
    %c0_6 = arith.constant 0 : index
    %c0_7 = arith.constant 0 : index
    %7 = vector.load %arg3[%c0_4, %c0_5, %c0_6, %c0_7] : memref<1x3x2x128xf32, #tpu.memory_space<vmem>>, vector<1x1x2x128xf32>
    %8 = vector.shape_cast %7 : vector<1x1x2x128xf32> to vector<2x128xf32>
    %9 = vector.shape_cast %6 : vector<2x128xf32> to vector<1x1x2x128xf32>
    tpu.vector_store %arg3[%c0_4, %c0_5, %c0_6, %c0_7], %9 {strides = array<i32>} : memref<1x3x2x128xf32, #tpu.memory_space<vmem>>, vector<1x1x2x128xf32>,
    %c0_8 = arith.constant 0 : index
    %c1 = arith.constant 1 : index
    %c0_9 = arith.constant 0 : index
    %c0_10 = arith.constant 0 : index
    %10 = vector.load %arg2[%c0_8, %c1, %c0_9, %c0_10] : memref<1x3x2x128xi8, #tpu.memory_space<vmem>>, vector<1x1x2x128xi8>
    %11 = vector.shape_cast %10 : vector<1x1x2x128xi8> to vector<2x128xi8>
    %12 = arith.uitofp %11 : vector<2x128xi8> to vector<2x128xf32>
    %cst_11 = arith.constant 0.0150077688 : f32
    %13 = vector.broadcast %cst_11 : f32 to vector<2x128xf32>
    %14 = arith.mulf %12, %13 : vector<2x128xf32>
    %cst_12 = arith.constant 1.75209713 : f32
    %15 = vector.broadcast %cst_12 : f32 to vector<2x128xf32>
    %16 = arith.subf %14, %15 : vector<2x128xf32>
    %c0_13 = arith.constant 0 : index
    %c1_14 = arith.constant 1 : index
    %c0_15 = arith.constant 0 : index
    %c0_16 = arith.constant 0 : index
    %17 = vector.load %arg3[%c0_13, %c1_14, %c0_15, %c0_16] : memref<1x3x2x128xf32, #tpu.memory_space<vmem>>, vector<1x1x2x128xf32>
    %18 = vector.shape_cast %17 : vector<1x1x2x128xf32> to vector<2x128xf32>
    %19 = vector.shape_cast %16 : vector<2x128xf32> to vector<1x1x2x128xf32>
    tpu.vector_store %arg3[%c0_13, %c1_14, %c0_15, %c0_16], %19 {strides = array<i32>} : memref<1x3x2x128xf32, #tpu.memory_space<vmem>>, vector<1x1x2x128xf32>,
    %c0_17 = arith.constant 0 : index
    %c2 = arith.constant 2 : index
    %c0_18 = arith.constant 0 : index
    %c0_19 = arith.constant 0 : index
    %20 = vector.load %arg2[%c0_17, %c2, %c0_18, %c0_19] : memref<1x3x2x128xi8, #tpu.memory_space<vmem>>, vector<1x1x2x128xi8>
    %21 = vector.shape_cast %20 : vector<1x1x2x128xi8> to vector<2x128xi8>
    %22 = arith.uitofp %21 : vector<2x128xi8> to vector<2x128xf32>
    %cst_20 = arith.constant 0.0142200654 : f32
    %23 = vector.broadcast %cst_20 : f32 to vector<2x128xf32>
    %24 = arith.mulf %22, %23 : vector<2x128xf32>
    %cst_21 = arith.constant 1.48021972 : f32
    %25 = vector.broadcast %cst_21 : f32 to vector<2x128xf32>
    %26 = arith.subf %24, %25 : vector<2x128xf32>
    %c0_22 = arith.constant 0 : index
    %c2_23 = arith.constant 2 : index
    %c0_24 = arith.constant 0 : index
    %c0_25 = arith.constant 0 : index
    %27 = vector.load %arg3[%c0_22, %c2_23, %c0_24, %c0_25] : memref<1x3x2x128xf32, #tpu.memory_space<vmem>>, vector<1x1x2x128xf32>
    %28 = vector.shape_cast %27 : vector<1x1x2x128xf32> to vector<2x128xf32>
    %29 = vector.shape_cast %26 : vector<2x128xf32> to vector<1x1x2x128xf32>
    tpu.vector_store %arg3[%c0_22, %c2_23, %c0_24, %c0_25], %29 {strides = array<i32>} : memref<1x3x2x128xf32, #tpu.memory_space<vmem>>, vector<1x1x2x128xf32>,
    return
  }
  func.func @transform_0(%arg0: i32, %arg1: i32) -> (i32, i32, i32, i32) {
    %c0_i32 = arith.constant 0 : i32
    %c0_i32_0 = arith.constant 0 : i32
    %c0_i32_1 = arith.constant 0 : i32
    return %arg0, %c0_i32, %arg1, %c0_i32_0 : i32, i32, i32, i32
  }
  func.func @transform_1(%arg0: i32, %arg1: i32) -> (i32, i32, i32, i32) {
    %c0_i32 = arith.constant 0 : i32
    %c0_i32_0 = arith.constant 0 : i32
    %c0_i32_1 = arith.constant 0 : i32
    return %arg0, %c0_i32, %arg1, %c0_i32_0 : i32, i32, i32, i32
  }
}

</mosaic_0001>

<bundles_post_ra>
// kernel: tpu_custom_call.1
= control target key start
LH: loop header
LB: loop body
LE: loop exit
PB: predicated region body
PF: predicated region fallthrough
CT: control target
= control target key end

     0   :  { %s116_s0 = inlined_call_operand.vmem [shape: u8[1,3,2,128], index: 0, kind: input, shape index: {}]   ;;  %s117_s1 = inlined_call_operand.hbm [shape: f32[1,3,2,128], index: 1, kind: output, shape index: {}]  }
   0x1   :  { %v9_v0 = vld [vmem:[%s116_s0] sm:$0x1]  ;;  %v51_v1 = vld [vmem:[%s116_s0 + $0x1] sm:$0x1]  ;;  %v53_v2 = vld [vmem:[%s116_s0 + $0x2] sm:$0x1] }
   0x2   :  { %v10_v3 = vunpack.c.0.s8 %v9_v0  ;;  %v18_v4 = vunpack.c.0.s8 %v51_v1  ;;  %v27_v5 = vunpack.c.0.s8 %v53_v2 }
   0x3   :  { %6 = vsyncpa [#allocation3], 0  ;;  %s82_s12 = smov [#allocation2]  }
   0x4   :  { %v11_v6 = vand.u32 255, %v10_v3  ;;  %v19_v7 = vand.u32 255, %v18_v4  ;;  %v28_v8 = vand.u32 255, %v27_v5  ;;  %s39_s13 = sshll.u32 %s82_s12, 4  ;;  %s40_s13 = int_to_ptr.vmem [resolvable:$true] %s39_s13 }
   0x5   :  { %s58_s0 = scalar_lea.vmem %s40_s13, 96  ;;  %p63_p1 = scmp.lt.s32.totalorder %s40_s13, %s40_s13 }
   0x6   :  { %v12_v9 = vcvt.s32.f32 %v11_v6  ;;  %v20_v10 = vcvt.s32.f32 %v19_v7  ;;  %v29_v11 = vcvt.s32.f32 %v28_v8  ;;  %p59_p0 = scmp.ne.s32.totalorder %s40_s13, %s58_s0  ;;  %p64_p2 = scmp.lt.s32.totalorder %s58_s0, %s58_s0 }
   0x8   :  { %v13_v12 = vmul.f32 0.014598426, %v12_v9  ;;  %v21_v13 = vmul.f32 0.015007769, %v20_v10  ;;  %v30_v14 = vmul.f32 0.014220065, %v29_v11  ;;  %p65_p3 = por %p64_p2, %p63_p1 }
   0xa   :  { %v50_v15 = vadd.f32 -1.7922626, %v13_v12  ;;  %v52_v16 = vadd.f32 -1.7520971, %v21_v13  ;;  %v54_v17 = vadd.f32 -1.4802197, %v30_v14  ;;  %p66_p4 = pnand %p65_p3, %p59_p0 }
   0xc   :  { %15 = vst [vmem:[#allocation2] sm:$0x3] %v50_v15  ;;  %24 = vst [vmem:[#allocation2 + $0x2] sm:$0x3] %v52_v16 }
   0xd   :  { %33 = vst [vmem:[#allocation2 + $0x4] sm:$0x3] %v54_v17 }
   0xe   :  { %69 = shalt.err (!%p66_p4)
}
   0xf   :  { %s70_s16 = scalar_lea.hbm %s117_s1, 96 }
  0x10   :  { %p71_p5 = scmp.ne.s32.totalorder %s117_s1, %s70_s16  ;;  %p74_p6 = scmp.lt.u32.totalorder %s70_s16, %s117_s1 }
  0x12   :  { %p76_p7 = pnand %p74_p6, %p71_p5 }
  0x14   :  { %79 = shalt.err (!%p76_p7)
}
  0x15   :  { %s83_s21 = smov 32   ;;  %s84_s22 = smov 2  }
  0x16   :  { %45 = dma.vmem_to_hbm [thread:$0]  %s40_s13, 96, %s117_s1, [#allocation3], %s83_s21, %s83_s21, %s84_s22  }
  0x17   :  { %80 = dma.done.wait [#allocation3], 96  }
  0x18   :  { %81 = vsyncadd [#allocation3], 4294967200 }
  0x19   :  { %49 = vsyncpa [#allocation3], 1 }

</bundles_post_ra>
